<compile_context>
chip_gen: v6e
topology: v6e:2x2x1
jax: 0.10.0
libtpu: 0.0.40
codegen_flags: <defaults>
</compile_context>

<pallas_src>
import math

import jax
import jax.numpy as jnp
from jax import lax
from jax.experimental import pallas as pl
from jax.experimental.pallas import tpu as pltpu


# ----------------------------- configuration --------------------------------
B = 2           # batch
T = 8           # sequence length
C = 32          # n_embd
NH = 4          # n_head
HD = C // NH    # head dim
EPS = 1e-5
NEG_INF = -1e30  # finite mask value (NaN-safe vs -inf)


# ------------------------------- kernel -------------------------------------
def block_kernel(x_ref,
                 ln1w_ref, ln1b_ref,
                 wqkv3_ref, bqkv3_ref,
                 wpro3_ref, bpro_ref,
                 ln2w_ref, ln2b_ref,
                 wfc_ref, bfc_ref,
                 wfp_ref, bfp_ref,
                 o_ref):
    # One batch element per grid step: x_ref is (T, C).
    x = x_ref[...]

    def layernorm(h, w_ref, b_ref):
        mu = jnp.mean(h, axis=-1, keepdims=True)
        d = h - mu
        var = jnp.mean(d * d, axis=-1, keepdims=True)
        return d * lax.rsqrt(var + EPS) * w_ref[...] + b_ref[...]

    # ---------------- attention branch ----------------
    h = layernorm(x, ln1w_ref, ln1b_ref)                      # (T, C)

    # Head-major QKV straight from the MXU: one batched matmul over the
    # (3*NH) "group" axis.  wqkv3 is (3*NH, C, HD), bqkv3 is (3*NH, 1, HD);
    # the 1/sqrt(HD) scale is already folded into the Q slabs in the wrapper.
    hb = jnp.broadcast_to(h, (3 * NH, T, C))                  # tiny, hoisted
    qkv = jnp.einsum('gtc,gcd->gtd', hb, wqkv3_ref[...],
                     preferred_element_type=jnp.float32)
    qkv = qkv + bqkv3_ref[...]                                # (3*NH, T, HD)
    qh = qkv[0 * NH:1 * NH]                                   # (NH, T, HD)
    kh = qkv[1 * NH:2 * NH]
    vh = qkv[2 * NH:3 * NH]

    # Head-batched attention scores (contraction on last dims, no explicit
    # transpose of K materialized).
    s = jnp.einsum('htd,hkd->htk', qh, kh,
                   preferred_element_type=jnp.float32)        # (NH, T, T)

    # Causal mask generated in-kernel: a couple of VPU iota/compare ops on
    # data already in vregs (no HBM mask input).
    row = lax.broadcasted_iota(jnp.int32, (T, T), 0)
    col = lax.broadcasted_iota(jnp.int32, (T, T), 1)
    causal = jnp.broadcast_to((col <= row)[None, :, :], s.shape)
    s = jnp.where(causal, s, NEG_INF)

    m = jnp.max(s, axis=-1, keepdims=True)
    e = jnp.exp(s - m)
    denom = jnp.sum(e, axis=-1, keepdims=True)
    p = e * pl.reciprocal(denom, approx=True)                 # divide on EUP

    y = jnp.einsum('htk,hkd->htd', p, vh,
                   preferred_element_type=jnp.float32)        # (NH, T, HD)

    # Output projection: head-batched matmul with the (NH, HD, C) proj slabs,
    # then a single reduce over heads (y_cat @ Wproj == sum_h y_h @ Wproj_h).
    z = jnp.einsum('htd,hdc->htc', y, wpro3_ref[...],
                   preferred_element_type=jnp.float32)        # (NH, T, C)
    attn_out = jnp.sum(z, axis=0) + bpro_ref[...]             # (T, C)

    x1 = x + attn_out                                         # residual

    # ---------------- MLP branch ----------------
    h2 = layernorm(x1, ln2w_ref, ln2b_ref)
    ff = jnp.dot(h2, wfc_ref[...], preferred_element_type=jnp.float32)
    ff = ff + bfc_ref[...]                                    # (T, 4C) lane-dense
    # exact (erf) GELU, matching torch.nn.GELU() default
    ff = 0.5 * ff * (1.0 + lax.erf(ff * (1.0 / math.sqrt(2.0))))
    ff = jnp.dot(ff, wfp_ref[...], preferred_element_type=jnp.float32)
    ff = ff + bfp_ref[...]

    o_ref[...] = x1 + ff


# ------------------------------- wrapper -------------------------------------
def transformer_block(x, params):
    (ln1w, ln1b, wqkv, bqkv, wpro, bpro,
     ln2w, ln2b, wfc, bfc, wfp, bfp) = params

    Bb, Tt, Cc = x.shape
    nh, hd = NH, Cc // NH

    # ---- one-time (jit-fused) parameter prep: all free outside the kernel ----
    # Fold 1/sqrt(HD) into the Q columns of the fused QKV weight/bias.
    scale = 1.0 / math.sqrt(hd)
    col_scale = jnp.concatenate(
        [jnp.full((Cc,), scale, jnp.float32), jnp.ones((2 * Cc,), jnp.float32)])
    wqkv_s = wqkv * col_scale[None, :]
    bqkv_s = bqkv * col_scale[None, :]

    # Head-major QKV weights: (3*NH, C, HD), bias (3*NH, 1, HD).
    wqkv3 = (wqkv_s.reshape(Cc, 3, nh, hd)
             .transpose(1, 2, 0, 3)
             .reshape(3 * nh, Cc, hd))
    bqkv3 = bqkv_s.reshape(3 * nh, 1, hd)

    # Per-head output projection slabs: (NH, HD, C).
    wpro3 = wpro.reshape(nh, hd, Cc)

    # ---- BlockSpecs: x/out tiled over batch; params resident (constant idx) ----
    def rep_spec(shape):
        return pl.BlockSpec(shape, lambda b, _n=len(shape): (0,) * _n)

    x_spec = pl.BlockSpec((None, Tt, Cc), lambda b: (b, 0, 0))

    out = pl.pallas_call(
        block_kernel,
        out_shape=jax.ShapeDtypeStruct((Bb, Tt, Cc), jnp.float32),
        grid=(Bb,),
        in_specs=[x_spec,
                  rep_spec(ln1w.shape), rep_spec(ln1b.shape),
                  rep_spec(wqkv3.shape), rep_spec(bqkv3.shape),
                  rep_spec(wpro3.shape), rep_spec(bpro.shape),
                  rep_spec(ln2w.shape), rep_spec(ln2b.shape),
                  rep_spec(wfc.shape), rep_spec(bfc.shape),
                  rep_spec(wfp.shape), rep_spec(bfp.shape)],
        out_specs=x_spec,
        # Batch axis is independent -> megacore sharding on v7x (2 TCs).
        compiler_params=pltpu.CompilerParams(
            dimension_semantics=("parallel",)),
    )(x, ln1w, ln1b, wqkv3, bqkv3, wpro3, bpro,
      ln2w, ln2b, wfc, bfc, wfp, bfp)

    return out


# --------------------------- pure-JAX reference ------------------------------
def reference_block(x, params):
    (ln1w, ln1b, wqkv, bqkv, wpro, bpro,
     ln2w, ln2b, wfc, bfc, wfp, bfp) = params

    def ln(h, w, b):
        mu = jnp.mean(h, axis=-1, keepdims=True)
        var = jnp.mean((h - mu) ** 2, axis=-1, keepdims=True)
        return (h - mu) / jnp.sqrt(var + EPS) * w + b

    h = ln(x, ln1w, ln1b)
    qkv = h @ wqkv + bqkv
    q, k, v = jnp.split(qkv, 3, axis=-1)
    q = q.reshape(B, T, NH, HD).transpose(0, 2, 1, 3)
    k = k.reshape(B, T, NH, HD).transpose(0, 2, 1, 3)
    v = v.reshape(B, T, NH, HD).transpose(0, 2, 1, 3)
    s = jnp.einsum('bhqd,bhkd->bhqk', q, k) / math.sqrt(HD)
    mask = jnp.tril(jnp.ones((T, T), dtype=bool))
    s = jnp.where(mask, s, -jnp.inf)
    p = jax.nn.softmax(s, axis=-1)
    y = jnp.einsum('bhqk,bhkd->bhqd', p, v)
    y = y.transpose(0, 2, 1, 3).reshape(B, T, C)
    x1 = x + (y @ wpro + bpro)

    h2 = ln(x1, ln2w, ln2b)
    ff = h2 @ wfc + bfc
    ff = 0.5 * ff * (1.0 + lax.erf(ff / math.sqrt(2.0)))
    ff = ff @ wfp + bfp
    return x1 + ff


# --------------------------------- main --------------------------------------
if __name__ == "__main__":
    key = jax.random.PRNGKey(0)
    keys = jax.random.split(key, 8)

    x = jax.random.normal(keys[0], (B, T, C), dtype=jnp.float32)

    # deterministic synthetic parameters (GPT-style init scale)
    ln1w = jnp.ones((1, C), jnp.float32)
    ln1b = jnp.zeros((1, C), jnp.float32)
    ln2w = jnp.ones((1, C), jnp.float32)
    ln2b = jnp.zeros((1, C), jnp.float32)
    wqkv = 0.02 * jax.random.normal(keys[1], (C, 3 * C), jnp.float32)
    bqkv = 0.01 * jax.random.normal(keys[2], (1, 3 * C), jnp.float32)
    wpro = 0.02 * jax.random.normal(keys[3], (C, C), jnp.float32)
    bpro = 0.01 * jax.random.normal(keys[4], (1, C), jnp.float32)
    wfc = 0.02 * jax.random.normal(keys[5], (C, 4 * C), jnp.float32)
    bfc = 0.01 * jax.random.normal(keys[6], (1, 4 * C), jnp.float32)
    wfp = 0.02 * jax.random.normal(keys[7], (4 * C, C), jnp.float32)
    bfp = jnp.zeros((1, C), jnp.float32)

    params = (ln1w, ln1b, wqkv, bqkv, wpro, bpro,
              ln2w, ln2b, wfc, bfc, wfp, bfp)

    out = jax.jit(transformer_block)(x, params)
    out = jax.block_until_ready(out)

    ref = reference_block(x, params)
    assert out.shape == (B, T, C)
    # Tolerance allows the approximate EUP reciprocal in the softmax
    # normalization (~2^-12 relative error per row).
    assert jnp.allclose(out, ref, atol=1e-3, rtol=1e-3), "mismatch vs reference"

    print("KERNEL_OK")
</pallas_src>

<mosaic_0001>
module attributes {stable_mosaic.version = 11 : i64} {
  func.func @block_kernel(%arg0: i32, %arg1: memref<1x8x32xf32, #tpu.memory_space<vmem>>, %arg2: memref<1x32xf32, #tpu.memory_space<vmem>>, %arg3: memref<1x32xf32, #tpu.memory_space<vmem>>, %arg4: memref<12x32x8xf32, #tpu.memory_space<vmem>>, %arg5: memref<12x1x8xf32, #tpu.memory_space<vmem>>, %arg6: memref<4x8x32xf32, #tpu.memory_space<vmem>>, %arg7: memref<1x32xf32, #tpu.memory_space<vmem>>, %arg8: memref<1x32xf32, #tpu.memory_space<vmem>>, %arg9: memref<1x32xf32, #tpu.memory_space<vmem>>, %arg10: memref<32x128xf32, #tpu.memory_space<vmem>>, %arg11: memref<1x128xf32, #tpu.memory_space<vmem>>, %arg12: memref<128x32xf32, #tpu.memory_space<vmem>>, %arg13: memref<1x32xf32, #tpu.memory_space<vmem>>, %arg14: memref<1x8x32xf32, #tpu.memory_space<vmem>>) attributes {dimension_semantics = [#tpu.dimension_semantics<parallel>], iteration_bounds = array<i64: 2>, scalar_prefetch = 0 : i64, scratch_operands = 0 : i64, tpu.core_type = #tpu.core_type<tc>, window_params = [{transform_indices = @transform_0, window_bounds = array<i64: 1, 8, 32>}, {pipeline_mode = #tpu.pipeline_mode<synchronous>, transform_indices = @transform_1, window_bounds = array<i64: 1, 32>}, {pipeline_mode = #tpu.pipeline_mode<synchronous>, transform_indices = @transform_2, window_bounds = array<i64: 1, 32>}, {pipeline_mode = #tpu.pipeline_mode<synchronous>, transform_indices = @transform_3, window_bounds = array<i64: 12, 32, 8>}, {pipeline_mode = #tpu.pipeline_mode<synchronous>, transform_indices = @transform_4, window_bounds = array<i64: 12, 1, 8>}, {pipeline_mode = #tpu.pipeline_mode<synchronous>, transform_indices = @transform_5, window_bounds = array<i64: 4, 8, 32>}, {pipeline_mode = #tpu.pipeline_mode<synchronous>, transform_indices = @transform_6, window_bounds = array<i64: 1, 32>}, {pipeline_mode = #tpu.pipeline_mode<synchronous>, transform_indices = @transform_7, window_bounds = array<i64: 1, 32>}, {pipeline_mode = #tpu.pipeline_mode<synchronous>, transform_indices = @transform_8, window_bounds = array<i64: 1, 32>}, {pipeline_mode = #tpu.pipeline_mode<synchronous>, transform_indices = @transform_9, window_bounds = array<i64: 32, 128>}, {pipeline_mode = #tpu.pipeline_mode<synchronous>, transform_indices = @transform_10, window_bounds = array<i64: 1, 128>}, {pipeline_mode = #tpu.pipeline_mode<synchronous>, transform_indices = @transform_11, window_bounds = array<i64: 128, 32>}, {pipeline_mode = #tpu.pipeline_mode<synchronous>, transform_indices = @transform_12, window_bounds = array<i64: 1, 32>}, {transform_indices = @transform_13, window_bounds = array<i64: 1, 8, 32>}]} {
    %c0 = arith.constant 0 : index
    %c0_0 = arith.constant 0 : index
    %c0_1 = arith.constant 0 : index
    %0 = vector.load %arg1[%c0, %c0_0, %c0_1] : memref<1x8x32xf32, #tpu.memory_space<vmem>>, vector<1x8x32xf32>
    %1 = vector.shape_cast %0 : vector<1x8x32xf32> to vector<8x32xf32>
    %cst = arith.constant dense<0.000000e+00> : vector<8xf32>
    %2 = vector.multi_reduction <add>, %1, %cst [1] : vector<8x32xf32> to vector<8xf32>
    %3 = vector.shape_cast %2 : vector<8xf32> to vector<8x1xf32>
    %cst_2 = arith.constant 3.200000e+01 : f32
    %4 = vector.broadcast %cst_2 : f32 to vector<8x1xf32>
    %5 = arith.divf %3, %4 : vector<8x1xf32>
    %6 = vector.broadcast %5 : vector<8x1xf32> to vector<8x32xf32>
    %7 = arith.subf %1, %6 : vector<8x32xf32>
    %8 = arith.mulf %7, %7 : vector<8x32xf32>
    %cst_3 = arith.constant dense<0.000000e+00> : vector<8xf32>
    %9 = vector.multi_reduction <add>, %8, %cst_3 [1] : vector<8x32xf32> to vector<8xf32>
    %10 = vector.shape_cast %9 : vector<8xf32> to vector<8x1xf32>
    %cst_4 = arith.constant 3.200000e+01 : f32
    %11 = vector.broadcast %cst_4 : f32 to vector<8x1xf32>
    %12 = arith.divf %10, %11 : vector<8x1xf32>
    %cst_5 = arith.constant 9.99999974E-6 : f32
    %13 = vector.broadcast %cst_5 : f32 to vector<8x1xf32>
    %14 = arith.addf %12, %13 : vector<8x1xf32>
    %15 = math.rsqrt %14 : vector<8x1xf32>
    %16 = vector.broadcast %15 : vector<8x1xf32> to vector<8x32xf32>
    %17 = arith.mulf %7, %16 : vector<8x32xf32>
    %c0_6 = arith.constant 0 : index
    %c0_7 = arith.constant 0 : index
    %18 = vector.load %arg2[%c0_6, %c0_7] : memref<1x32xf32, #tpu.memory_space<vmem>>, vector<1x32xf32>
    %19 = vector.broadcast %18 : vector<1x32xf32> to vector<8x32xf32>
    %20 = arith.mulf %17, %19 : vector<8x32xf32>
    %c0_8 = arith.constant 0 : index
    %c0_9 = arith.constant 0 : index
    %21 = vector.load %arg3[%c0_8, %c0_9] : memref<1x32xf32, #tpu.memory_space<vmem>>, vector<1x32xf32>
    %22 = vector.broadcast %21 : vector<1x32xf32> to vector<8x32xf32>
    %23 = arith.addf %20, %22 : vector<8x32xf32>
    %24 = vector.shape_cast %23 : vector<8x32xf32> to vector<1x8x32xf32>
    %25 = vector.broadcast %24 : vector<1x8x32xf32> to vector<12x8x32xf32>
    %c0_10 = arith.constant 0 : index
    %c0_11 = arith.constant 0 : index
    %c0_12 = arith.constant 0 : index
    %26 = vector.load %arg4[%c0_10, %c0_11, %c0_12] : memref<12x32x8xf32, #tpu.memory_space<vmem>>, vector<12x32x8xf32>
    "tpu.trace_start"() <{level = 10 : i32, message = "gtc,gcd->gtd"}> : () -> ()
    %cst_13 = arith.constant dense<0.000000e+00> : vector<12x8x8xf32>
    %27 = tpu.matmul %25, %26, %cst_13 {dimension_numbers = #tpu.dot_dimension_numbers<[2], [1], [1], [2], [0, 0, 0, 1, 1, 2], [0], [0]>} : vector<12x8x32xf32>, vector<12x32x8xf32>, vector<12x8x8xf32> -> vector<12x8x8xf32>
    "tpu.trace_stop"() : () -> ()
    %c0_14 = arith.constant 0 : index
    %c0_15 = arith.constant 0 : index
    %c0_16 = arith.constant 0 : index
    %28 = vector.load %arg5[%c0_14, %c0_15, %c0_16] : memref<12x1x8xf32, #tpu.memory_space<vmem>>, vector<12x1x8xf32>
    %29 = vector.broadcast %28 : vector<12x1x8xf32> to vector<12x8x8xf32>
    %30 = arith.addf %27, %29 : vector<12x8x8xf32>
    %31 = vector.extract_strided_slice %30 {offsets = [0, 0, 0], sizes = [4, 8, 8], strides = [1, 1, 1]} : vector<12x8x8xf32> to vector<4x8x8xf32>
    %32 = vector.extract_strided_slice %30 {offsets = [4, 0, 0], sizes = [4, 8, 8], strides = [1, 1, 1]} : vector<12x8x8xf32> to vector<4x8x8xf32>
    %33 = vector.extract_strided_slice %30 {offsets = [8, 0, 0], sizes = [4, 8, 8], strides = [1, 1, 1]} : vector<12x8x8xf32> to vector<4x8x8xf32>
    "tpu.trace_start"() <{level = 10 : i32, message = "htd,hkd->htk"}> : () -> ()
    %cst_17 = arith.constant dense<0.000000e+00> : vector<4x8x8xf32>
    %34 = tpu.matmul %31, %32, %cst_17 {dimension_numbers = #tpu.dot_dimension_numbers<[2], [2], [1], [1], [0, 0, 0, 1, 1, 1], [0], [0]>} : vector<4x8x8xf32>, vector<4x8x8xf32>, vector<4x8x8xf32> -> vector<4x8x8xf32>
    "tpu.trace_stop"() : () -> ()
    %35 = tpu.iota {dimensions = array<i32: 0>} : vector<8x8xi32>
    %36 = tpu.iota {dimensions = array<i32: 1>} : vector<8x8xi32>
    %37 = arith.cmpi sle, %36, %35 : vector<8x8xi32>
    %38 = vector.shape_cast %37 : vector<8x8xi1> to vector<1x8x8xi1>
    %39 = vector.shape_cast %38 : vector<1x8x8xi1> to vector<1x8x8xi1>
    %40 = vector.broadcast %39 : vector<1x8x8xi1> to vector<4x8x8xi1>
    %cst_18 = arith.constant -1.000000e+30 : f32
    %41 = vector.broadcast %cst_18 : f32 to vector<4x8x8xf32>
    %42 = arith.select %40, %34, %41 : vector<4x8x8xi1>, vector<4x8x8xf32>
    %cst_19 = arith.constant dense<0xFF800000> : vector<4x8xf32>
    %43 = vector.multi_reduction <maximumf>, %42, %cst_19 [2] : vector<4x8x8xf32> to vector<4x8xf32>
    %44 = vector.shape_cast %43 : vector<4x8xf32> to vector<4x8x1xf32>
    %45 = vector.broadcast %44 : vector<4x8x1xf32> to vector<4x8x8xf32>
    %46 = arith.subf %42, %45 : vector<4x8x8xf32>
    %47 = math.exp %46 : vector<4x8x8xf32>
    %cst_20 = arith.constant dense<0.000000e+00> : vector<4x8xf32>
    %48 = vector.multi_reduction <add>, %47, %cst_20 [2] : vector<4x8x8xf32> to vector<4x8xf32>
    %49 = vector.shape_cast %48 : vector<4x8xf32> to vector<4x8x1xf32>
    %50 = tpu.reciprocal %49 {approx = true} : vector<4x8x1xf32> -> vector<4x8x1xf32>
    %51 = vector.broadcast %50 : vector<4x8x1xf32> to vector<4x8x8xf32>
    %52 = arith.mulf %47, %51 : vector<4x8x8xf32>
    "tpu.trace_start"() <{level = 10 : i32, message = "htk,hkd->htd"}> : () -> ()
    %cst_21 = arith.constant dense<0.000000e+00> : vector<4x8x8xf32>
    %53 = tpu.matmul %52, %33, %cst_21 {dimension_numbers = #tpu.dot_dimension_numbers<[2], [1], [1], [2], [0, 0, 0, 1, 1, 2], [0], [0]>} : vector<4x8x8xf32>, vector<4x8x8xf32>, vector<4x8x8xf32> -> vector<4x8x8xf32>
    "tpu.trace_stop"() : () -> ()
    %c0_22 = arith.constant 0 : index
    %c0_23 = arith.constant 0 : index
    %c0_24 = arith.constant 0 : index
    %54 = vector.load %arg6[%c0_22, %c0_23, %c0_24] : memref<4x8x32xf32, #tpu.memory_space<vmem>>, vector<4x8x32xf32>
    "tpu.trace_start"() <{level = 10 : i32, message = "htd,hdc->htc"}> : () -> ()
    %cst_25 = arith.constant dense<0.000000e+00> : vector<4x8x32xf32>
    %55 = tpu.matmul %53, %54, %cst_25 {dimension_numbers = #tpu.dot_dimension_numbers<[2], [1], [1], [2], [0, 0, 0, 1, 1, 2], [0], [0]>} : vector<4x8x8xf32>, vector<4x8x32xf32>, vector<4x8x32xf32> -> vector<4x8x32xf32>
    "tpu.trace_stop"() : () -> ()
    %cst_26 = arith.constant dense<0.000000e+00> : vector<8x32xf32>
    %56 = vector.multi_reduction <add>, %55, %cst_26 [0] : vector<4x8x32xf32> to vector<8x32xf32>
    %c0_27 = arith.constant 0 : index
    %c0_28 = arith.constant 0 : index
    %57 = vector.load %arg7[%c0_27, %c0_28] : memref<1x32xf32, #tpu.memory_space<vmem>>, vector<1x32xf32>
    %58 = vector.broadcast %57 : vector<1x32xf32> to vector<8x32xf32>
    %59 = arith.addf %56, %58 : vector<8x32xf32>
    %60 = arith.addf %1, %59 : vector<8x32xf32>
    %cst_29 = arith.constant dense<0.000000e+00> : vector<8xf32>
    %61 = vector.multi_reduction <add>, %60, %cst_29 [1] : vector<8x32xf32> to vector<8xf32>
    %62 = vector.shape_cast %61 : vector<8xf32> to vector<8x1xf32>
    %cst_30 = arith.constant 3.200000e+01 : f32
    %63 = vector.broadcast %cst_30 : f32 to vector<8x1xf32>
    %64 = arith.divf %62, %63 : vector<8x1xf32>
    %65 = vector.broadcast %64 : vector<8x1xf32> to vector<8x32xf32>
    %66 = arith.subf %60, %65 : vector<8x32xf32>
    %67 = arith.mulf %66, %66 : vector<8x32xf32>
    %cst_31 = arith.constant dense<0.000000e+00> : vector<8xf32>
    %68 = vector.multi_reduction <add>, %67, %cst_31 [1] : vector<8x32xf32> to vector<8xf32>
    %69 = vector.shape_cast %68 : vector<8xf32> to vector<8x1xf32>
    %cst_32 = arith.constant 3.200000e+01 : f32
    %70 = vector.broadcast %cst_32 : f32 to vector<8x1xf32>
    %71 = arith.divf %69, %70 : vector<8x1xf32>
    %cst_33 = arith.constant 9.99999974E-6 : f32
    %72 = vector.broadcast %cst_33 : f32 to vector<8x1xf32>
    %73 = arith.addf %71, %72 : vector<8x1xf32>
    %74 = math.rsqrt %73 : vector<8x1xf32>
    %75 = vector.broadcast %74 : vector<8x1xf32> to vector<8x32xf32>
    %76 = arith.mulf %66, %75 : vector<8x32xf32>
    %c0_34 = arith.constant 0 : index
    %c0_35 = arith.constant 0 : index
    %77 = vector.load %arg8[%c0_34, %c0_35] : memref<1x32xf32, #tpu.memory_space<vmem>>, vector<1x32xf32>
    %78 = vector.broadcast %77 : vector<1x32xf32> to vector<8x32xf32>
    %79 = arith.mulf %76, %78 : vector<8x32xf32>
    %c0_36 = arith.constant 0 : index
    %c0_37 = arith.constant 0 : index
    %80 = vector.load %arg9[%c0_36, %c0_37] : memref<1x32xf32, #tpu.memory_space<vmem>>, vector<1x32xf32>
    %81 = vector.broadcast %80 : vector<1x32xf32> to vector<8x32xf32>
    %82 = arith.addf %79, %81 : vector<8x32xf32>
    %c0_38 = arith.constant 0 : index
    %c0_39 = arith.constant 0 : index
    %83 = vector.load %arg10[%c0_38, %c0_39] : memref<32x128xf32, #tpu.memory_space<vmem>>, vector<32x128xf32>
    %cst_40 = arith.constant dense<0.000000e+00> : vector<8x128xf32>
    %84 = tpu.matmul %82, %83, %cst_40 {dimension_numbers = #tpu.dot_dimension_numbers<[1], [0], [0], [1], [0, 0, 1, 1], [], []>} : vector<8x32xf32>, vector<32x128xf32>, vector<8x128xf32> -> vector<8x128xf32>
    %c0_41 = arith.constant 0 : index
    %c0_42 = arith.constant 0 : index
    %85 = vector.load %arg11[%c0_41, %c0_42] : memref<1x128xf32, #tpu.memory_space<vmem>>, vector<1x128xf32>
    %86 = vector.broadcast %85 : vector<1x128xf32> to vector<8x128xf32>
    %87 = arith.addf %84, %86 : vector<8x128xf32>
    %cst_43 = arith.constant 5.000000e-01 : f32
    %88 = vector.broadcast %cst_43 : f32 to vector<8x128xf32>
    %89 = arith.mulf %88, %87 : vector<8x128xf32>
    %cst_44 = arith.constant 0.707106769 : f32
    %90 = vector.broadcast %cst_44 : f32 to vector<8x128xf32>
    %91 = arith.mulf %87, %90 : vector<8x128xf32>
    %92 = math.erf %91 : vector<8x128xf32>
    %cst_45 = arith.constant 1.000000e+00 : f32
    %93 = vector.broadcast %cst_45 : f32 to vector<8x128xf32>
    %94 = arith.addf %93, %92 : vector<8x128xf32>
    %95 = arith.mulf %89, %94 : vector<8x128xf32>
    %c0_46 = arith.constant 0 : index
    %c0_47 = arith.constant 0 : index
    %96 = vector.load %arg12[%c0_46, %c0_47] : memref<128x32xf32, #tpu.memory_space<vmem>>, vector<128x32xf32>
    %cst_48 = arith.constant dense<0.000000e+00> : vector<8x32xf32>
    %97 = tpu.matmul %95, %96, %cst_48 {dimension_numbers = #tpu.dot_dimension_numbers<[1], [0], [0], [1], [0, 0, 1, 1], [], []>} : vector<8x128xf32>, vector<128x32xf32>, vector<8x32xf32> -> vector<8x32xf32>
    %c0_49 = arith.constant 0 : index
    %c0_50 = arith.constant 0 : index
    %98 = vector.load %arg13[%c0_49, %c0_50] : memref<1x32xf32, #tpu.memory_space<vmem>>, vector<1x32xf32>
    %99 = vector.broadcast %98 : vector<1x32xf32> to vector<8x32xf32>
    %100 = arith.addf %97, %99 : vector<8x32xf32>
    %101 = arith.addf %60, %100 : vector<8x32xf32>
    %c0_51 = arith.constant 0 : index
    %c0_52 = arith.constant 0 : index
    %c0_53 = arith.constant 0 : index
    %102 = vector.load %arg14[%c0_51, %c0_52, %c0_53] : memref<1x8x32xf32, #tpu.memory_space<vmem>>, vector<1x8x32xf32>
    %103 = vector.shape_cast %102 : vector<1x8x32xf32> to vector<8x32xf32>
    %104 = vector.shape_cast %101 : vector<8x32xf32> to vector<1x8x32xf32>
    tpu.vector_store %arg14[%c0_51, %c0_52, %c0_53], %104 {strides = array<i32>} : memref<1x8x32xf32, #tpu.memory_space<vmem>>, vector<1x8x32xf32>,
    return
  }
  func.func @transform_0(%arg0: i32) -> (i32, i32, i32) {
    %c0_i32 = arith.constant 0 : i32
    %c0_i32_0 = arith.constant 0 : i32
    %c0_i32_1 = arith.constant 0 : i32
    return %arg0, %c0_i32, %c0_i32_0 : i32, i32, i32
  }
  func.func @transform_1(%arg0: i32) -> (i32, i32) {
    %c0_i32 = arith.constant 0 : i32
    %c0_i32_0 = arith.constant 0 : i32
    %c0_i32_1 = arith.constant 0 : i32
    return %c0_i32, %c0_i32_0 : i32, i32
  }
  func.func @transform_2(%arg0: i32) -> (i32, i32) {
    %c0_i32 = arith.constant 0 : i32
    %c0_i32_0 = arith.constant 0 : i32
    %c0_i32_1 = arith.constant 0 : i32
    return %c0_i32, %c0_i32_0 : i32, i32
  }
  func.func @transform_3(%arg0: i32) -> (i32, i32, i32) {
    %c0_i32 = arith.constant 0 : i32
    %c0_i32_0 = arith.constant 0 : i32
    %c0_i32_1 = arith.constant 0 : i32
    %c0_i32_2 = arith.constant 0 : i32
    return %c0_i32, %c0_i32_0, %c0_i32_1 : i32, i32, i32
  }
  func.func @transform_4(%arg0: i32) -> (i32, i32, i32) {
    %c0_i32 = arith.constant 0 : i32
    %c0_i32_0 = arith.constant 0 : i32
    %c0_i32_1 = arith.constant 0 : i32
    %c0_i32_2 = arith.constant 0 : i32
    return %c0_i32, %c0_i32_0, %c0_i32_1 : i32, i32, i32
  }
  func.func @transform_5(%arg0: i32) -> (i32, i32, i32) {
    %c0_i32 = arith.constant 0 : i32
    %c0_i32_0 = arith.constant 0 : i32
    %c0_i32_1 = arith.constant 0 : i32
    %c0_i32_2 = arith.constant 0 : i32
    return %c0_i32, %c0_i32_0, %c0_i32_1 : i32, i32, i32
  }
  func.func @transform_6(%arg0: i32) -> (i32, i32) {
    %c0_i32 = arith.constant 0 : i32
    %c0_i32_0 = arith.constant 0 : i32
    %c0_i32_1 = arith.constant 0 : i32
    return %c0_i32, %c0_i32_0 : i32, i32
  }
  func.func @transform_7(%arg0: i32) -> (i32, i32) {
    %c0_i32 = arith.constant 0 : i32
    %c0_i32_0 = arith.constant 0 : i32
    %c0_i32_1 = arith.constant 0 : i32
    return %c0_i32, %c0_i32_0 : i32, i32
  }
  func.func @transform_8(%arg0: i32) -> (i32, i32) {
    %c0_i32 = arith.constant 0 : i32
    %c0_i32_0 = arith.constant 0 : i32
    %c0_i32_1 = arith.constant 0 : i32
    return %c0_i32, %c0_i32_0 : i32, i32
  }
  func.func @transform_9(%arg0: i32) -> (i32, i32) {
    %c0_i32 = arith.constant 0 : i32
    %c0_i32_0 = arith.constant 0 : i32
    %c0_i32_1 = arith.constant 0 : i32
    return %c0_i32, %c0_i32_0 : i32, i32
  }
  func.func @transform_10(%arg0: i32) -> (i32, i32) {
    %c0_i32 = arith.constant 0 : i32
    %c0_i32_0 = arith.constant 0 : i32
    %c0_i32_1 = arith.constant 0 : i32
    return %c0_i32, %c0_i32_0 : i32, i32
  }
  func.func @transform_11(%arg0: i32) -> (i32, i32) {
    %c0_i32 = arith.constant 0 : i32
    %c0_i32_0 = arith.constant 0 : i32
    %c0_i32_1 = arith.constant 0 : i32
    return %c0_i32, %c0_i32_0 : i32, i32
  }
  func.func @transform_12(%arg0: i32) -> (i32, i32) {
    %c0_i32 = arith.constant 0 : i32
    %c0_i32_0 = arith.constant 0 : i32
    %c0_i32_1 = arith.constant 0 : i32
    return %c0_i32, %c0_i32_0 : i32, i32
  }
  func.func @transform_13(%arg0: i32) -> (i32, i32, i32) {
    %c0_i32 = arith.constant 0 : i32
    %c0_i32_0 = arith.constant 0 : i32
    %c0_i32_1 = arith.constant 0 : i32
    return %arg0, %c0_i32, %c0_i32_0 : i32, i32, i32
  }
}

</mosaic_0001>

<bundles_post_ra>
// kernel: transformer_block.1
= control target key start
LH: loop header
LB: loop body
LE: loop exit
PB: predicated region body
PF: predicated region fallthrough
CT: control target
= control target key end

     0   :  { %s3861_s0 = inlined_call_operand.vmem [shape: f32[2,8,32], index: 0, kind: input, shape index: {}]   ;;  %s3862_s1 = inlined_call_operand.vmem [shape: f32[1,32], index: 1, kind: input, shape index: {}]   ;;  %s3863_s2 = inlined_call_operand.vmem [shape: f32[1,32], index: 2, kind: input, shape index: {}]   ;;  %s3864_s3 = inlined_call_operand.vmem [shape: f32[12,32,8], index: 3, kind: input, shape index: {}]   ;;  %s3865_s4 = inlined_call_operand.vmem [shape: f32[12,1,8], index: 4, kind: input, shape index: {}]   ;;  %s3866_s5 = inlined_call_operand.vmem [shape: f32[4,8,32], index: 5, kind: input, shape index: {}]   ;;  %s3867_s6 = inlined_call_operand.vmem [shape: f32[1,32], index: 6, kind: input, shape index: {}]   ;;  %s3868_s7 = inlined_call_operand.vmem [shape: f32[1,32], index: 7, kind: input, shape index: {}]   ;;  %s3869_s8 = inlined_call_operand.vmem [shape: f32[1,32], index: 8, kind: input, shape index: {}]   ;;  %s3870_s9 = inlined_call_operand.vmem [shape: f32[32,128], index: 9, kind: input, shape index: {}]   ;;  %s3871_s10 = inlined_call_operand.vmem [shape: f32[1,128], index: 10, kind: input, shape index: {}]   ;;  %s3872_s11 = inlined_call_operand.vmem [shape: f32[128,32], index: 11, kind: input, shape index: {}]   ;;  %s3873_s12 = inlined_call_operand.vmem [shape: f32[1,32], index: 12, kind: input, shape index: {}]   ;;  %s3874_s13 = inlined_call_operand.hbm [shape: f32[2,8,32], index: 13, kind: output, shape index: {}]  }
   0x1   :  { %3875 = sst [smem:[#allocation5_spill]] %s3861_s0 }
   0x2   :  { %3876 = sst [smem:[#allocation6_spill]] %s3862_s1 }
   0x3   :  { %3877 = sst [smem:[#allocation7_spill]] %s3863_s2 }
   0x4   :  { %3878 = sst [smem:[#allocation8_spill]] %s3864_s3 }
   0x5   :  { %18 = vsyncpa [#allocation3], 0 }
   0x6   :  { %20 = vsyncpa [#allocation3 + $0x1], 0  ;;  %s3293_s25 = smov 0   ;;  %s3295_s26 = smov 0  }
   0x7   :  { %s3297_s27 = smov 0   ;;  %s3299_s28 = smov 0  }
   0x8 LB: > { %s3314_s29 = sadd.s32 4294967295, %s3218_s28   ;;  %s2693_s30 = sadd.s32 4294967294, %s3218_s28   ;;  %s3218_s28 = sphi %s3299_s28, %s3888_s28   ;;  %s3214_s27 = sphi %s3297_s27, %s3887_s27   ;;  %s3210_s26 = sphi %s3295_s26, %s3886_s26   ;;  %s3206_s25 = sphi %s3293_s25, %s3885_s25  }
   0x9   : > { %s3318_s14 = sadd.s32 1, %s3218_s28   ;;  %s311_s15 = sadd.s32 1, %s3214_s27 }
   0xa   : > { %s308_s16 = ssub.s32 %s3218_s28, %s3318_s14  ;;  %p321_p0 = scmp.ne.s32.totalorder %s3214_s27, %s3210_s26 }
   0xb   : > { %p309_p1 = scmp.eq.s32.totalorder %s308_s16, 0  ;;  %p322_p2 = scmp.eq.s32.totalorder %s3314_s29, 1 }
   0xc   : > { %p327_p3 = scmp.ne.s32.totalorder %s3210_s26, %s3206_s25  ;;  %p328_p4 = scmp.eq.s32.totalorder %s2693_s30, 1 }
   0xd   : > { %s3329_s17 = scalar_select %p309_p1, %s3214_s27, %s311_s15  }
   0xe   : > { %p3331_p5 = por %p322_p2, %p321_p0  ;;  %p3335_p6 = por %p328_p4, %p327_p3 }
   0xf   : > { %p2696_p7 = scmp.ge.s32.totalorder %s3218_s28, 1  ;;  %p389_p8 = scmp.lt.s32.totalorder %s3218_s28, 3 }
  0x11   : > { %p390_p9 = pnand %p2696_p7, %p389_p8 }
  0x12   : > { %p432_p10 = scmp.lt.s32.totalorder (!%p390_p9), %s3314_s29, 1  ;;  %s3881_s0 = sld [smem:[#allocation5_spill]] (!%p390_p9) }
  0x13   : > { %393 = sbr.rel (%p390_p9) target bundleno = 2208 (0x8a0), region = 72  ;;  %s3882_s3 = sld [smem:[#allocation8_spill]] (!%p390_p9) }
  0x14   : > { %s3883_s1 = sld [smem:[#allocation6_spill]] (!%p390_p9)  ;;  %s2748_s30 = sshll.u32 (!%p390_p9), %s3314_s29, 7 }
  0x15   : > { %s3884_s2 = sld [smem:[#allocation7_spill]] (!%p390_p9) }
  0x18   : > { %s433_s20 = scalar_select %p432_p10, %s3314_s29, 1  ;;  %vm437_vm0 = vcmask 261120   ;;  %v3220_v7 = vmov 0.0   ;;  %vm3221_vm1 = vmmov 0   ;;  %vm1443_vm2 = vcmask 64512  }
  0x19   : > { %2857 = vmatprep.subr.mxu0 %v3220_v7  ;;  %2890 = vmatprep.subr.mxu1 %v3220_v7  ;;  %v471_v8 = vld [vmem:[%s3882_s3 + $0x18] sm:$0xff]  ;;  %v470_v10 = vld [vmem:[%s3882_s3 + $0x10] sm:$0xff]  ;;  %v469_v12 = vld [vmem:[%s3882_s3 + $0x8] sm:$0xff]  ;;  %s3222_s29 = smov [#allocation2]  }
  0x1a   : > { %s2698_s21 = sshll.u32 %s433_s20, 3  ;;  %v483_v9 = vld [vmem:[%s3882_s3 + $0x78] sm:$0xff]  ;;  %2858 = vmatpush3.msra.mxu0 %v471_v8  ;;  %v482_v11 = vld [vmem:[%s3882_s3 + $0x70] sm:$0xff]  ;;  %v481_v13 = vld [vmem:[%s3882_s3 + $0x68] sm:$0xff]  ;;  %2865 = vmatprep.mubr.msk.f32.mxu0 %vm3221_vm1, %v3220_v7 }
  0x1b   : > { %s435_s24 = scalar_lea.vmem %s3881_s0, %s2698_s21  ;;  %2891 = vmatpush3.msra.mxu1 %v483_v9  ;;  %2859 = vmatprep.subr.mxu0 %v3220_v7  ;;  %v468_v14 = vld [vmem:[%s3882_s3] sm:$0xff]  ;;  %v475_v25 = vld [vmem:[%s3882_s3 + $0x38] sm:$0xff]  ;;  %v474_v27 = vld [vmem:[%s3882_s3 + $0x30] sm:$0xff]  ;;  %s429_s21 = sand.u32 1, %s3210_s26  }
  0x1c   : > { %v3346_v0 = vld [vmem:[%s435_s24] sm:$0xff]  ;;  %2892 = vmatprep.subr.mxu1 %v3220_v7  ;;  %2860 = vmatpush3.msra.mxu0 %v470_v10  ;;  %v491_v26 = vld [vmem:[%s3882_s3 + $0xb8] sm:$0xff]  ;;  %v490_v28 = vld [vmem:[%s3882_s3 + $0xb0] sm:$0xff]  ;;  %s2697_s22 = sshll.u32 %s429_s21, 3 }
  0x1d   : > { %v438_v1 = vsel %vm437_vm0, %v3346_v0, 0.0  ;;  %2893 = vmatpush3.msra.mxu1 %v482_v11  ;;  %2861 = vmatprep.subr.mxu0 %v3220_v7  ;;  %v480_v15 = vld [vmem:[%s3882_s3 + $0x60] sm:$0xff]  ;;  %v473_v29 = vld [vmem:[%s3882_s3 + $0x28] sm:$0xff]  ;;  %v479_v33 = vld [vmem:[%s3882_s3 + $0x58] sm:$0xff]  ;;  %s431_s15 = scalar_lea.vmem [#allocation2], %s2697_s22  ;;  %s3162_s22 = sshll.u32 %s3222_s29, 4  ;;  %s3163_s22 = int_to_ptr.vmem [resolvable:$false] %s3162_s22 }
  0x1e   : > { %439 = vadd.xlane.f32.xlu0 %v438_v1  ;;  %2894 = vmatprep.subr.mxu1 %v3220_v7  ;;  %v2699_v20 = vld [vmem:[%s3883_s1] ss:$0 sm:$0xff]  ;;  %v489_v30 = vld [vmem:[%s3882_s3 + $0xa8] sm:$0xff]  ;;  %v499_v34 = vld [vmem:[%s3882_s3 + $0xf8] sm:$0xff]  ;;  %s2634_s16 = sshll.u32 %s431_s15, 4  ;;  %s2632_s1 = scalar_lea.hbm %s3874_s13, %s2748_s30  ;;  %s2635_s16 = int_to_ptr.vmem [resolvable:$true] %s2634_s16 }
  0x1f   : > { %2862 = vmatpush3.msra.mxu0 %v469_v12  ;;  %2895 = vmatpush3.msra.mxu1 %v481_v13  ;;  %v2700_v22 = vld [vmem:[%s3884_s2] ss:$0 sm:$0xff]  ;;  %v478_v35 = vld [vmem:[%s3882_s3 + $0x50] sm:$0xff]  ;;  %v477_v37 = vld [vmem:[%s3882_s3 + $0x48] sm:$0xff]  ;;  %s2621_s2 = scalar_lea.sflag [#allocation3], %s429_s21  ;;  %s3164_s23 = scalar_lea.vmem %s3163_s22, 256 }
  0x20   : > { %2863 = vmatprep.subr.mxu0 %v3220_v7  ;;  %2896 = vmatprep.subr.mxu1 %v3220_v7  ;;  %v472_v31 = vld [vmem:[%s3882_s3 + $0x20] sm:$0xff]  ;;  %v498_v36 = vld [vmem:[%s3882_s3 + $0xf0] sm:$0xff]  ;;  %v497_v38 = vld [vmem:[%s3882_s3 + $0xe8] sm:$0xff]  ;;  %p3165_p0 = scmp.lt.s32.totalorder %s2635_s16, %s3163_s22 }
  0x21   : > { %2864 = vmatpush3.msra.mxu0 %v468_v14  ;;  %2897 = vmatpush3.msra.mxu1 %v480_v15  ;;  %v488_v32 = vld [vmem:[%s3882_s3 + $0xa0] sm:$0xff]  ;;  %v487_v41 = vld [vmem:[%s3882_s3 + $0x98] sm:$0xff]  ;;  %v486_v43 = vld [vmem:[%s3882_s3 + $0x90] sm:$0xff] }
  0x22   : > { %2868 = vmatprep.subr.mxu0 %v3220_v7  ;;  %2898 = vmatprep.mubr.msk.f32.mxu1 %vm3221_vm1, %v3220_v7  ;;  %v476_v39 = vld [vmem:[%s3882_s3 + $0x40] sm:$0xff]  ;;  %v507_v42 = vld [vmem:[%s3882_s3 + $0x138] sm:$0xff]  ;;  %v506_v44 = vld [vmem:[%s3882_s3 + $0x130] sm:$0xff] }
  0x23   : > { %2912 = vmatprep.subr.mxu1 %v3220_v7  ;;  %v496_v40 = vld [vmem:[%s3882_s3 + $0xe0] sm:$0xff]  ;;  %v485_v45 = vld [vmem:[%s3882_s3 + $0x88] sm:$0xff]  ;;  %v495_v49 = vld [vmem:[%s3882_s3 + $0xd8] sm:$0xff] }
  0x24   : > { %v505_v46 = vld [vmem:[%s3882_s3 + $0x128] sm:$0xff]  ;;  %v484_v47 = vld [vmem:[%s3882_s3 + $0x80] sm:$0xff]  ;;  %v515_v50 = vld [vmem:[%s3882_s3 + $0x178] sm:$0xff] }
  0x25   : > { %v504_v48 = vld [vmem:[%s3882_s3 + $0x120] sm:$0xff]  ;;  %v494_v51 = vld [vmem:[%s3882_s3 + $0xd0] sm:$0xff]  ;;  %v493_v53 = vld [vmem:[%s3882_s3 + $0xc8] sm:$0xff] }
  0x26   : > { %v514_v52 = vld [vmem:[%s3882_s3 + $0x170] sm:$0xff]  ;;  %v513_v54 = vld [vmem:[%s3882_s3 + $0x168] sm:$0xff]  ;;  %v492_v55 = vld [vmem:[%s3882_s3 + $0xc0] sm:$0xff] }
  0x27   : > { %v512_v56 = vld [vmem:[%s3882_s3 + $0x160] sm:$0xff]  ;;  %v503_v57 = vld [vmem:[%s3882_s3 + $0x118] sm:$0xff]  ;;  %v502_v58 = vld [vmem:[%s3882_s3 + $0x110] sm:$0xff] }
  0x28   : > { %v501_v59 = vld [vmem:[%s3882_s3 + $0x108] sm:$0xff]  ;;  %v500_v60 = vld [vmem:[%s3882_s3 + $0x100] sm:$0xff]  ;;  %v511_v61 = vld [vmem:[%s3882_s3 + $0x158] sm:$0xff] }
  0x29   : > { %v510_v62 = vld [vmem:[%s3882_s3 + $0x150] sm:$0xff]  ;;  %v509_v63 = vld [vmem:[%s3882_s3 + $0x148] sm:$0xff]  ;;  %v508_v1 = vld [vmem:[%s3882_s3 + $0x140] sm:$0xff]  ;;  %s3158_s3 = scalar_lea.vmem %s2635_s16, 128 }
  0x2a   : > { %v2708_v11 = vld [vmem:[%s3865_s4 + $0x7] ss:$0 sm:$0xff]  ;;  %v2704_v14 = vld [vmem:[%s3865_s4 + $0x3] ss:$0 sm:$0xff]  ;;  %p3159_p11 = scmp.ne.s32.totalorder %s2635_s16, %s3158_s3  ;;  %p3166_p1 = scmp.lt.s32.totalorder %s3164_s23, %s3158_s3 }
  0x2c   : > { %p3160_p12 = pnand %p3159_p11, %p3331_p5  ;;  %p3167_p2 = por %p3166_p1, %p3165_p0 }
  0x2e   : > { %p3161_p13 = pneg %p3160_p12 }
  0x30   : > { %p3168_p3 = pnand %p3167_p2, %p3161_p13 }
  0xa7   : > { %v440_v2 = vpop.xlane.xlu0 %439 }
  0xa8   : > { %v442_v3 = vmul.f32 0.03125, %v440_v2 }
  0xaa   : > { %v443_v4 = vsub.f32 %v3346_v0, %v442_v3 }
  0xac   : > { %v444_v5 = vmul.f32 %v443_v4, %v443_v4 }
  0xae   : > { %v445_v6 = vsel %vm437_vm0, %v444_v5, 0.0 }
  0xaf   : > { %446 = vadd.xlane.f32.xlu0 %v445_v6 }
 0x138   : > { %v447_v16 = vpop.xlane.xlu0 %446 }
 0x139   : > { %v448_v17 = vmul.f32 0.03125, %v447_v16 }
 0x13b   : > { %v449_v18 = vadd.f32 1e-05, %v448_v17 }
 0x13d   : > { %3136 = vrsqrt.f32 %v449_v18 }
 0x14a   : > { %v3137_v19 = vpop.eup %3136 }
 0x14b   : > { %v451_v21 = vmul.f32 %v3137_v19, %v443_v4  ;;  %v2705_v19 = vld [vmem:[%s3865_s4 + $0x4] ss:$0 sm:$0xff] }
 0x14d   : > { %v459_v23 = vmul.f32 %v2699_v20, %v451_v21  ;;  %v2710_v20 = vld [vmem:[%s3865_s4 + $0x9] ss:$0 sm:$0xff] }
 0x14f   : > { %v3396_v24 = vadd.f32 %v2700_v22, %v459_v23  ;;  %v2701_v22 = vld [vmem:[%s3865_s4] ss:$0 sm:$0xff] }
 0x151   : > { %2866 = vmatmul.mubr.msk.f32.vlgmr.msra.gmra.mxu0 %vm437_vm0, %v3396_v24  ;;  %2899 = vmatmul.mubr.msk.f32.vlgmr.msra.gmra.mxu1 %vm437_vm0, %v3396_v24 }
 0x152   : > { %2869 = vmatpush3.msra.mxu0 %v475_v25  ;;  %2913 = vmatpush3.msra.mxu1 %v491_v26  ;;  %v2706_v25 = vld [vmem:[%s3865_s4 + $0x5] ss:$0 sm:$0xff] }
 0x153   : > { %2870 = vmatprep.subr.mxu0 %v3220_v7  ;;  %2914 = vmatprep.subr.mxu1 %v3220_v7 }
 0x154   : > { %2871 = vmatpush3.msra.mxu0 %v474_v27  ;;  %2915 = vmatpush3.msra.mxu1 %v490_v28 }
 0x155   : > { %2872 = vmatprep.subr.mxu0 %v3220_v7  ;;  %2916 = vmatprep.subr.mxu1 %v3220_v7 }
 0x156   : > { %2873 = vmatpush3.msra.mxu0 %v473_v29  ;;  %2917 = vmatpush3.msra.mxu1 %v489_v30  ;;  %v2702_v30 = vld [vmem:[%s3865_s4 + $0x1] ss:$0 sm:$0xff] }
 0x157   : > { %2874 = vmatprep.subr.mxu0 %v3220_v7  ;;  %2918 = vmatprep.subr.mxu1 %v3220_v7 }
 0x158   : > { %2875 = vmatpush3.msra.mxu0 %v472_v31  ;;  %2876 = vmatprep.mubr.msk.f32.mxu0 %vm3221_vm1, %v3220_v7 }
 0x159   : > { %2919 = vmatpush3.msra.mxu1 %v488_v32  ;;  %2920 = vmatprep.mubr.msk.f32.mxu1 %vm3221_vm1, %v3220_v7 }
 0x15a   : > { %2877 = vmatmul.mubr.msk.f32.vlgmr.msra.gmra.mxu0 %vm437_vm0, %v3396_v24  ;;  %2879 = vmatprep.subr.mxu0 %v3220_v7 }
 0x15b   : > { %2921 = vmatmul.mubr.msk.f32.vlgmr.msra.gmra.mxu1 %vm437_vm0, %v3396_v24  ;;  %2934 = vmatprep.subr.mxu1 %v3220_v7 }
 0x15c   : > { %2880 = vmatpush3.msra.mxu0 %v479_v33  ;;  %2935 = vmatpush3.msra.mxu1 %v499_v34  ;;  %v2707_v33 = vld [vmem:[%s3865_s4 + $0x6] ss:$0 sm:$0xff] }
 0x15d   : > { %2881 = vmatprep.subr.mxu0 %v3220_v7  ;;  %2936 = vmatprep.subr.mxu1 %v3220_v7 }
 0x15e   : > { %2882 = vmatpush3.msra.mxu0 %v478_v35  ;;  %2937 = vmatpush3.msra.mxu1 %v498_v36  ;;  %v2703_v35 = vld [vmem:[%s3865_s4 + $0x2] ss:$0 sm:$0xff] }
 0x15f   : > { %2883 = vmatprep.subr.mxu0 %v3220_v7  ;;  %2938 = vmatprep.subr.mxu1 %v3220_v7 }
 0x160   : > { %2884 = vmatpush3.msra.mxu0 %v477_v37  ;;  %2939 = vmatpush3.msra.mxu1 %v497_v38 }
 0x161   : > { %2885 = vmatprep.subr.mxu0 %v3220_v7  ;;  %2940 = vmatprep.subr.mxu1 %v3220_v7 }
 0x162   : > { %2886 = vmatpush3.msra.mxu0 %v476_v39  ;;  %2887 = vmatprep.mubr.msk.f32.mxu0 %vm3221_vm1, %v3220_v7 }
 0x163   : > { %2941 = vmatpush3.msra.mxu1 %v496_v40  ;;  %2942 = vmatprep.mubr.msk.f32.mxu1 %vm3221_vm1, %v3220_v7 }
 0x164   : > { %2888 = vmatmul.mubr.msk.f32.vlgmr.msra.gmra.mxu0 %vm437_vm0, %v3396_v24  ;;  %2901 = vmatprep.subr.mxu0 %v3220_v7 }
 0x165   : > { %2943 = vmatmul.mubr.msk.f32.vlgmr.msra.gmra.mxu1 %vm437_vm0, %v3396_v24  ;;  %2956 = vmatprep.subr.mxu1 %v3220_v7 }
 0x166   : > { %2902 = vmatpush3.msra.mxu0 %v487_v41  ;;  %2957 = vmatpush3.msra.mxu1 %v507_v42  ;;  %v2709_v41 = vld [vmem:[%s3865_s4 + $0x8] ss:$0 sm:$0xff] }
 0x167   : > { %2903 = vmatprep.subr.mxu0 %v3220_v7  ;;  %2958 = vmatprep.subr.mxu1 %v3220_v7 }
 0x168   : > { %2904 = vmatpush3.msra.mxu0 %v486_v43  ;;  %2959 = vmatpush3.msra.mxu1 %v506_v44 }
 0x169   : > { %2905 = vmatprep.subr.mxu0 %v3220_v7  ;;  %2960 = vmatprep.subr.mxu1 %v3220_v7 }
 0x16a   : > { %2906 = vmatpush3.msra.mxu0 %v485_v45  ;;  %2961 = vmatpush3.msra.mxu1 %v505_v46 }
 0x16b   : > { %2907 = vmatprep.subr.mxu0 %v3220_v7  ;;  %2962 = vmatprep.subr.mxu1 %v3220_v7 }
 0x16c   : > { %2908 = vmatpush3.msra.mxu0 %v484_v47  ;;  %2909 = vmatprep.mubr.msk.f32.mxu0 %vm3221_vm1, %v3220_v7 }
 0x16d   : > { %2963 = vmatpush3.msra.mxu1 %v504_v48  ;;  %2964 = vmatprep.mubr.msk.f32.mxu1 %vm3221_vm1, %v3220_v7  ;;  %v1748_v48 = vlaneseq }
 0x16e   : > { %2910 = vmatmul.mubr.msk.f32.vlgmr.msra.gmra.mxu0 %vm437_vm0, %v3396_v24  ;;  %2923 = vmatprep.subr.mxu0 %v3220_v7 }
 0x16f   : > { %2965 = vmatmul.mubr.msk.f32.vlgmr.msra.gmra.mxu1 %vm437_vm0, %v3396_v24  ;;  %2978 = vmatprep.subr.mxu1 %v3220_v7 }
 0x170   : > { %2924 = vmatpush3.msra.mxu0 %v495_v49  ;;  %2979 = vmatpush3.msra.mxu1 %v515_v50  ;;  %v1749_v50 = vshrl.u32 %v1748_v48, 7 }
 0x171   : > { %2925 = vmatprep.subr.mxu0 %v3220_v7  ;;  %2980 = vmatprep.subr.mxu1 %v3220_v7 }
 0x172   : > { %2926 = vmatpush3.msra.mxu0 %v494_v51  ;;  %2981 = vmatpush3.msra.mxu1 %v514_v52  ;;  %v1751_v51 = vand.u32 127, %v1748_v48 }
 0x173   : > { %2927 = vmatprep.subr.mxu0 %v3220_v7  ;;  %2982 = vmatprep.subr.mxu1 %v3220_v7 }
 0x174   : > { %2928 = vmatpush3.msra.mxu0 %v493_v53  ;;  %2983 = vmatpush3.msra.mxu1 %v513_v54  ;;  %vm1752_vm3 = vcmp.le.s32.totalorder %v1751_v51, %v1749_v50 }
 0x175   : > { %2929 = vmatprep.subr.mxu0 %v3220_v7  ;;  %2984 = vmatprep.subr.mxu1 %v3220_v7 }
 0x176   : > { %2930 = vmatpush3.msra.mxu0 %v492_v55  ;;  %2931 = vmatprep.mubr.msk.f32.mxu0 %vm3221_vm1, %v3220_v7 }
 0x177   : > { %2985 = vmatpush3.msra.mxu1 %v512_v56  ;;  %2986 = vmatprep.mubr.msk.f32.mxu1 %vm3221_vm1, %v3220_v7 }
 0x178   : > { %2932 = vmatmul.mubr.msk.f32.vlgmr.msra.gmra.mxu0 %vm437_vm0, %v3396_v24  ;;  %2945 = vmatprep.subr.mxu0 %v3220_v7 }
 0x179   : > { %2987 = vmatmul.mubr.msk.f32.vlgmr.msra.gmra.mxu1 %vm437_vm0, %v3396_v24  ;;  %2946 = vmatpush3.msra.mxu0 %v503_v57 }
 0x17a   : > { %2947 = vmatprep.subr.mxu0 %v3220_v7  ;;  %2953 = vmatprep.mubr.msk.f32.mxu0 %vm3221_vm1, %v3220_v7 }
 0x17b   : > { %2948 = vmatpush3.msra.mxu0 %v502_v58  ;;  %3004 = vmatprep.subr.mxu1 %v3220_v7 }
 0x17c   : > { %2949 = vmatprep.subr.mxu0 %v3220_v7  ;;  %3006 = vmatprep.mubr.msk.f32.mxu1 %vm3221_vm1, %v3220_v7 }
 0x17d   : > { %2950 = vmatpush3.msra.mxu0 %v501_v59 }
 0x17e   : > { %2951 = vmatprep.subr.mxu0 %v3220_v7 }
 0x17f   : > { %2952 = vmatpush3.msra.mxu0 %v500_v60 }
 0x180   : > { %2954 = vmatmul.mubr.msk.f32.vlgmr.msra.gmra.mxu0 %vm437_vm0, %v3396_v24  ;;  %2967 = vmatprep.subr.mxu0 %v3220_v7 }
 0x181   : > { %2968 = vmatpush3.msra.mxu0 %v511_v61  ;;  %2975 = vmatprep.mubr.msk.f32.mxu0 %vm3221_vm1, %v3220_v7 }
 0x182   : > { %2969 = vmatprep.subr.mxu0 %v3220_v7 }
 0x183   : > { %2970 = vmatpush3.msra.mxu0 %v510_v62 }
 0x184   : > { %2971 = vmatprep.subr.mxu0 %v3220_v7 }
 0x185   : > { %2972 = vmatpush3.msra.mxu0 %v509_v63 }
 0x186   : > { %2973 = vmatprep.subr.mxu0 %v3220_v7 }
 0x187   : > { %2974 = vmatpush3.msra.mxu0 %v508_v1 }
 0x188   : > { %2976 = vmatmul.mubr.msk.f32.vlgmr.msra.gmra.mxu0 %vm437_vm0, %v3396_v24  ;;  %2989 = vmatprep.subr.mxu0 %v3220_v7 }
 0x189   : > { %2991 = vmatprep.mubr.msk.f32.mxu0 %vm3221_vm1, %v3220_v7 }
 0x211   : > { %v669_v2 = vpop.f32.mrf.mxu0  ;;  %v879_v3 = vpop.f32.mrf.mxu1 }
 0x212   : > { %v880_v18 = vadd.f32 %v2704_v14, %v879_v3  ;;  %v670_v29 = vadd.f32 %v2701_v22, %v669_v2 }
 0x213   : > { %v2867_v4 = vpop.f32.mrf.mxu0  ;;  %v2900_v5 = vpop.f32.mrf.mxu1 }
 0x21a   : > { %v739_v6 = vpop.f32.mrf.mxu0 }
 0x21b   : > { %v1019_v8 = vpop.f32.mrf.mxu1  ;;  %v740_v32 = vadd.f32 %v2702_v30, %v739_v6 }
 0x21c   : > { %v2878_v9 = vpop.f32.mrf.mxu0  ;;  %v1020_v31 = vadd.f32 %v2706_v25, %v1019_v8 }
 0x21d   : > { %v2922_v10 = vpop.f32.mrf.mxu1 }
 0x224   : > { %v809_v12 = vpop.f32.mrf.mxu0 }
 0x225   : > { %v1159_v13 = vpop.f32.mrf.mxu1  ;;  %v810_v40 = vadd.f32 %v2703_v35, %v809_v12 }
 0x226   : > { %v1160_v15 = vadd.f32 %v2708_v11, %v1159_v13  ;;  %v2889_v16 = vpop.f32.mrf.mxu0 }
 0x227   : > { %v2944_v17 = vpop.f32.mrf.mxu1 }
 0x228   : > { %3005 = vmatpush3.xpose.msk.msra.mxu1 %vm1443_vm2, %v1160_v15 }
 0x229   : > { %3014 = vmatprep.subr.mxu1 %v3220_v7 }
 0x22b   : > { %3007 = vmatmul.mubr.msk.f32.vlgmr.msra.gmra.mxu1 %vm1443_vm2, %v880_v18 }
 0x22c   : > { %3016 = vmatprep.mubr.msk.f32.mxu1 %vm3221_vm1, %v3220_v7 }
 0x22e   : > { %v949_v21 = vpop.f32.mrf.mxu0 }
 0x22f   : > { %v950_v23 = vadd.f32 %v2705_v19, %v949_v21  ;;  %v1299_v24 = vpop.f32.mrf.mxu1 }
 0x230   : > { %v1300_v26 = vadd.f32 %v2710_v20, %v1299_v24  ;;  %v2911_v27 = vpop.f32.mrf.mxu0 }
 0x231   : > { %v2966_v28 = vpop.f32.mrf.mxu1  ;;  %2990 = vmatpush3.xpose.msk.msra.mxu0 %vm1443_vm2, %v950_v23 }
 0x232   : > { %3015 = vmatpush3.msra.mxu1 %v1300_v26  ;;  %2994 = vmatprep.subr.mxu0 %v3220_v7  ;;  %v2711_v28 = vld [vmem:[%s3865_s4 + $0xa] ss:$0 sm:$0xff] }
 0x233   : > { %3024 = vmatprep.subr.mxu1 %v3220_v7 }
 0x234   : > { %2992 = vmatmul.mubr.msk.f32.vlgmr.msra.gmra.mxu0 %vm1443_vm2, %v670_v29 }
 0x235   : > { %2995 = vmatpush3.xpose.msk.msra.mxu0 %vm1443_vm2, %v1020_v31  ;;  %2996 = vmatprep.mubr.msk.f32.mxu0 %vm3221_vm1, %v3220_v7 }
 0x236   : > { %2999 = vmatprep.subr.mxu0 %v3220_v7 }
 0x238   : > { %v1089_v34 = vpop.f32.mrf.mxu0  ;;  %2997 = vmatmul.mubr.msk.f32.vlgmr.msra.gmra.mxu0 %vm1443_vm2, %v740_v32  ;;  %v2712_v32 = vld [vmem:[%s3865_s4 + $0xb] ss:$0 sm:$0xff] }
 0x239   : > { %v1090_v36 = vadd.f32 %v2707_v33, %v1089_v34  ;;  %v3647_v37 = vpop.f32.mrf.mxu1  ;;  %3001 = vmatprep.mubr.msk.f32.mxu0 %vm3221_vm1, %v3220_v7 }
 0x23a   : > { %v2933_v38 = vpop.f32.mrf.mxu0  ;;  %v1440_v35 = vadd.f32 %v2712_v32, %v3647_v37  ;;  %v2095_v37 = vld [vmem:[%s3866_s5] sm:$0xff]  ;;  %v2534_v32 = vld [vmem:[%s3872_s11 + $0x48] sm:$0xff] }
 0x23b   : > { %v2988_v39 = vpop.f32.mrf.mxu1  ;;  %3000 = vmatpush3.xpose.msk.msra.mxu0 %vm1443_vm2, %v1090_v36 }
 0x23c   : > { %3009 = vmatprep.subr.mxu0 %v3220_v7 }
 0x23e   : > { %3002 = vmatmul.mubr.msk.f32.vlgmr.msra.gmra.mxu0 %vm1443_vm2, %v810_v40 }
 0x23f   : > { %3011 = vmatprep.mubr.msk.f32.mxu0 %vm3221_vm1, %v3220_v7 }
 0x240   : > { %v1229_v42 = vpop.f32.mrf.mxu0 }
 0x241   : > { %v1230_v43 = vadd.f32 %v2709_v41, %v1229_v42  ;;  %v2096_v41 = vld [vmem:[%s3866_s5 + $0x8] sm:$0xff]  ;;  %v2097_v42 = vld [vmem:[%s3866_s5 + $0x10] sm:$0xff] }
 0x242   : > { %v2955_v44 = vpop.f32.mrf.mxu0 }
 0x243   : > { %3010 = vmatpush3.msra.mxu0 %v1230_v43 }
 0x244   : > { %3019 = vmatprep.subr.mxu0 %v3220_v7 }
 0x248   : > { %v3660_v45 = vpop.f32.mrf.mxu0 }
 0x249   : > { %v1370_v31 = vadd.f32 %v2711_v28, %v3660_v45  ;;  %v2098_v45 = vld [vmem:[%s3866_s5 + $0x18] sm:$0xff] }
 0x24a   : > { %v2977_v46 = vpop.f32.mrf.mxu0 }
 0x2eb   : > { %v1744_v47 = vpop.f32.mrf.mxu1 }
 0x2ec   : > { %v1758_v60 = vsel %vm1752_vm3, %v1744_v47, -1e+30 }
 0x2ed   : > { %v3008_v49 = vpop.f32.mrf.mxu1  ;;  %v1768_v62 = vsel %vm1443_vm2, %v1758_v60, -inf }
 0x2f4   : > { %v1516_v52 = vpop.f32.mrf.mxu0 }
 0x2f5   : > { %v1755_v53 = vsel %vm1752_vm3, %v1516_v52, -1e+30 }
 0x2f6   : > { %v2993_v54 = vpop.f32.mrf.mxu0  ;;  %v1759_v55 = vsel %vm1443_vm2, %v1755_v53, -inf }
 0x2f7   : > { %1760 = vmax.xlane.f32.xlu1 %v1759_v55 }
 0x2f8   : > { %v1592_v56 = vpop.f32.mrf.mxu0 }
 0x2f9   : > { %v1756_v57 = vsel %vm1752_vm3, %v1592_v56, -1e+30 }
 0x2fa   : > { %v2998_v58 = vpop.f32.mrf.mxu0  ;;  %v1762_v59 = vsel %vm1443_vm2, %v1756_v57, -inf }
 0x2fb   : > { %1763 = vmax.xlane.f32.xlu1 %v1762_v59 }
 0x2fe   : > { %v1668_v61 = vpop.f32.mrf.mxu0 }
 0x2ff   : > { %v1757_v63 = vsel %vm1752_vm3, %v1668_v61, -1e+30  ;;  %1769 = vmax.xlane.f32.xlu1 %v1768_v62 }
 0x300   : > { %v3003_v1 = vpop.f32.mrf.mxu0  ;;  %v1765_v2 = vsel %vm1443_vm2, %v1757_v63, -inf }
 0x301   : > { %1766 = vmax.xlane.f32.xlu0 %v1765_v2 }
 0x380   : > { %v1761_v3 = vpop.xlane.xlu1 %1760 }
 0x381   : > { %v1771_v4 = vsub.f32 %v1755_v53, %v1761_v3  ;;  %v2741_v3 = vld [vmem:[%s3867_s6] ss:$0 sm:$0xff] }
 0x383   : > { %v1775_v5 = vmul.f32 1.442695, %v1771_v4 }
 0x384   : > { %v1764_v6 = vpop.xlane.xlu1 %1763 }
 0x385   : > { %3138 = vpow2.f32 %v1775_v5  ;;  %v1772_v8 = vsub.f32 %v1756_v57, %v1764_v6 }
 0x387   : > { %v1777_v9 = vmul.f32 1.442695, %v1772_v8 }
 0x388   : > { %v1770_v10 = vpop.xlane.xlu1 %1769 }
 0x389   : > { %3140 = vpow2.f32 %v1777_v9  ;;  %v1774_v11 = vsub.f32 %v1758_v60, %v1770_v10 }
 0x38a   : > { %v1767_v12 = vpop.xlane.xlu0 %1766 }
 0x38b   : > { %v1781_v13 = vmul.f32 1.442695, %v1774_v11  ;;  %v1773_v14 = vsub.f32 %v1757_v63, %v1767_v12 }
 0x38d   : > { %3142 = vpow2.f32 %v1781_v13  ;;  %v1779_v15 = vmul.f32 1.442695, %v1773_v14  ;;  %v2439_v14 = vld [vmem:[%s3870_s9 + $0x18] sm:$0xff] }
 0x38f   : > { %3144 = vpow2.f32 %v1779_v15  ;;  %v2437_v15 = vld [vmem:[%s3870_s9 + $0x8] sm:$0xff] }
 0x392   : > { %v3139_v16 = vpop.eup %3138 }
 0x393   : > { %v1783_v17 = vsel %vm1443_vm2, %v3139_v16, 0.0 }
 0x394   : > { %1784 = vadd.xlane.f32.xlu0 %v1783_v17  ;;  %v2540_v17 = vld [vmem:[%s3872_s11 + $0x78] sm:$0xff] }
 0x396   : > { %v3141_v18 = vpop.eup %3140 }
 0x397   : > { %v1786_v19 = vsel %vm1443_vm2, %v3141_v18, 0.0 }
 0x398   : > { %1787 = vadd.xlane.f32.xlu1 %v1786_v19  ;;  %v2538_v19 = vld [vmem:[%s3872_s11 + $0x68] sm:$0xff] }
 0x39a   : > { %v3143_v20 = vpop.eup %3142 }
 0x39b   : > { %v1792_v21 = vsel %vm1443_vm2, %v3143_v20, 0.0 }
 0x39c   : > { %v3145_v22 = vpop.eup %3144  ;;  %1793 = vadd.xlane.f32.xlu1 %v1792_v21 }
 0x39d   : > { %v1789_v23 = vsel %vm1443_vm2, %v3145_v22, 0.0 }
 0x39e   : > { %1790 = vadd.xlane.f32.xlu0 %v1789_v23 }
 0x41d   : > { %v1785_v24 = vpop.xlane.xlu0 %1784 }
 0x41e   : > { %3146 = vrcp.f32 %v1785_v24 }
 0x421   : > { %v1788_v25 = vpop.xlane.xlu1 %1787 }
 0x422   : > { %3148 = vrcp.f32 %v1788_v25  ;;  %v2742_v25 = vld [vmem:[%s3868_s7] ss:$0 sm:$0xff] }
 0x425   : > { %v1794_v26 = vpop.xlane.xlu1 %1793 }
 0x426   : > { %3150 = vrcp.f32 %v1794_v26 }
 0x427   : > { %v1791_v27 = vpop.xlane.xlu0 %1790 }
 0x428   : > { %3152 = vrcp.f32 %v1791_v27  ;;  %v2743_v27 = vld [vmem:[%s3869_s8] ss:$0 sm:$0xff] }
 0x42b   : > { %v3147_v29 = vpop.eup %3146 }
 0x42c   : > { %v1799_v30 = vmul.f32 %v3147_v29, %v3139_v16  ;;  %v2436_v16 = vld [vmem:[%s3870_s9] sm:$0xff] }
 0x42e   : > { %3012 = vmatmul.mubr.msk.f32.vlgmr.msra.gmra.mxu0 %vm1443_vm2, %v1799_v30  ;;  %v2536_v30 = vld [vmem:[%s3872_s11 + $0x58] sm:$0xff] }
 0x42f   : > { %v3149_v33 = vpop.eup %3148  ;;  %3020 = vmatpush3.msra.mxu0 %v1370_v31  ;;  %3021 = vmatprep.mubr.msk.f32.mxu0 %vm3221_vm1, %v3220_v7  ;;  %v2535_v31 = vld [vmem:[%s3872_s11 + $0x50] sm:$0xff] }
 0x430   : > { %v1800_v34 = vmul.f32 %v3149_v33, %v3141_v18  ;;  %3029 = vmatprep.subr.mxu0 %v3220_v7  ;;  %v2539_v18 = vld [vmem:[%s3872_s11 + $0x70] sm:$0xff]  ;;  %v2533_v33 = vld [vmem:[%s3872_s11 + $0x40] sm:$0xff] }
 0x432   : > { %3017 = vmatmul.mubr.msk.f32.vlgmr.msra.gmra.mxu1 %vm1443_vm2, %v1800_v34  ;;  %v2532_v34 = vld [vmem:[%s3872_s11 + $0x38] sm:$0xff] }
 0x433   : > { %v3151_v36 = vpop.eup %3150  ;;  %3025 = vmatpush3.msra.mxu1 %v1440_v35  ;;  %3026 = vmatprep.mubr.msk.f32.mxu1 %vm3221_vm1, %v3220_v7  ;;  %v2531_v35 = vld [vmem:[%s3872_s11 + $0x30] sm:$0xff] }
 0x434   : > { %v1802_v38 = vmul.f32 %v3151_v36, %v3143_v20  ;;  %3034 = vmatprep.subr.mxu1 %v3220_v7  ;;  %v2537_v20 = vld [vmem:[%s3872_s11 + $0x60] sm:$0xff]  ;;  %v2530_v36 = vld [vmem:[%s3872_s11 + $0x28] sm:$0xff] }
 0x435   : > { %v3153_v39 = vpop.eup %3152 }
 0x436   : > { %v1801_v40 = vmul.f32 %v3153_v39, %v3145_v22  ;;  %3027 = vmatmul.mubr.msk.f32.vlgmr.msra.gmra.mxu1 %vm1443_vm2, %v1802_v38  ;;  %v2529_v38 = vld [vmem:[%s3872_s11 + $0x20] sm:$0xff]  ;;  %v2528_v39 = vld [vmem:[%s3872_s11 + $0x18] sm:$0xff] }
 0x437   : > { %3036 = vmatprep.mubr.msk.f32.mxu1 %vm3221_vm1, %v3220_v7  ;;  %3035 = vmatpush3.msra.mxu1 %v2096_v41  ;;  %v2525_v41 = vld [vmem:[%s3872_s11] sm:$0xff] }
 0x438   : > { %3022 = vmatmul.mubr.msk.f32.vlgmr.msra.gmra.mxu0 %vm1443_vm2, %v1801_v40  ;;  %3044 = vmatprep.subr.mxu1 %v3220_v7  ;;  %v2527_v40 = vld [vmem:[%s3872_s11 + $0x10] sm:$0xff] }
 0x439   : > { %3031 = vmatprep.mubr.msk.f32.mxu0 %vm3221_vm1, %v3220_v7  ;;  %3030 = vmatpush3.msra.mxu0 %v2095_v37  ;;  %v2526_v37 = vld [vmem:[%s3872_s11 + $0x8] sm:$0xff] }
 0x43a   : > { %3039 = vmatprep.subr.mxu0 %v3220_v7 }
 0x4ee   : > { %v1872_v43 = vpop.f32.mrf.mxu0 }
 0x4ef   : > { %3032 = vmatmul.mubr.msk.f32.vlgmr.msra.gmra.mxu0 %vm1443_vm2, %v1872_v43 }
 0x4f0   : > { %v3013_v44 = vpop.f32.mrf.mxu0  ;;  %3040 = vmatpush3.msra.mxu0 %v2097_v42  ;;  %3041 = vmatprep.mubr.msk.f32.mxu0 %vm3221_vm1, %v3220_v7  ;;  %v2744_v42 = vld [vmem:[%s3871_s10] ss:$0 sm:$0xff] }
 0x4f1   : > { %3049 = vmatprep.subr.mxu0 %v3220_v7 }
 0x4f2   : > { %v1945_v46 = vpop.f32.mrf.mxu1 }
 0x4f3   : > { %3037 = vmatmul.mubr.msk.f32.vlgmr.msra.gmra.mxu1 %vm1443_vm2, %v1945_v46 }
 0x4f4   : > { %v3018_v47 = vpop.f32.mrf.mxu1  ;;  %3045 = vmatpush3.msra.mxu1 %v2098_v45  ;;  %3046 = vmatprep.mubr.msk.f32.mxu1 %vm3221_vm1, %v3220_v7 }
 0x4f5   : > { %3060 = vmatprep.subr.mxu1 %v3220_v7 }
 0x4f6   : > { %v2091_v48 = vpop.f32.mrf.mxu1 }
 0x4f7   : > { %3047 = vmatmul.mubr.msk.f32.vlgmr.msra.gmra.mxu1 %vm1443_vm2, %v2091_v48 }
 0x4f8   : > { %v2018_v49 = vpop.f32.mrf.mxu0  ;;  %v3028_v50 = vpop.f32.mrf.mxu1  ;;  %3092 = vmatprep.mubr.msk.f32.mxu1 %vm3221_vm1, %v3220_v7  ;;  %3061 = vmatpush3.msra.mxu1 %v2540_v17 }
 0x4f9   : > { %3042 = vmatmul.mubr.msk.f32.vlgmr.msra.gmra.mxu0 %vm1443_vm2, %v2018_v49  ;;  %3062 = vmatprep.subr.mxu1 %v3220_v7 }
 0x4fa   : > { %v3023_v51 = vpop.f32.mrf.mxu0  ;;  %3057 = vmatprep.mubr.msk.f32.mxu0 %vm3221_vm1, %v3220_v7  ;;  %3050 = vmatpush3.msra.mxu0 %v2439_v14 }
 0x4fb   : > { %3051 = vmatprep.subr.mxu0 %v3220_v7  ;;  %3063 = vmatpush3.msra.mxu1 %v2539_v18 }
 0x4fc   : > { %3064 = vmatprep.subr.mxu1 %v3220_v7 }
 0x4fd   : > { %3065 = vmatpush3.msra.mxu1 %v2538_v19 }
 0x4fe   : > { %3066 = vmatprep.subr.mxu1 %v3220_v7 }
 0x4ff   : > { %3067 = vmatpush3.msra.mxu1 %v2537_v20 }
 0x500   : > { %3068 = vmatprep.subr.mxu1 %v3220_v7 }
 0x501   : > { %3069 = vmatpush3.msra.mxu1 %v2536_v30 }
 0x502   : > { %3070 = vmatprep.subr.mxu1 %v3220_v7 }
 0x503   : > { %3071 = vmatpush3.msra.mxu1 %v2535_v31 }
 0x504   : > { %3072 = vmatprep.subr.mxu1 %v3220_v7 }
 0x505   : > { %3073 = vmatpush3.msra.mxu1 %v2534_v32 }
 0x506   : > { %3074 = vmatprep.subr.mxu1 %v3220_v7 }
 0x507   : > { %3075 = vmatpush3.msra.mxu1 %v2533_v33 }
 0x508   : > { %3076 = vmatprep.subr.mxu1 %v3220_v7 }
 0x509   : > { %3077 = vmatpush3.msra.mxu1 %v2532_v34 }
 0x50a   : > { %3078 = vmatprep.subr.mxu1 %v3220_v7 }
 0x50b   : > { %3079 = vmatpush3.msra.mxu1 %v2531_v35 }
 0x50c   : > { %3080 = vmatprep.subr.mxu1 %v3220_v7 }
 0x50d   : > { %3081 = vmatpush3.msra.mxu1 %v2530_v36 }
 0x50e   : > { %3082 = vmatprep.subr.mxu1 %v3220_v7 }
 0x50f   : > { %3083 = vmatpush3.msra.mxu1 %v2529_v38 }
 0x510   : > { %3084 = vmatprep.subr.mxu1 %v3220_v7 }
 0x511   : > { %3085 = vmatpush3.msra.mxu1 %v2528_v39 }
 0x512   : > { %3086 = vmatprep.subr.mxu1 %v3220_v7 }
 0x513   : > { %3087 = vmatpush3.msra.mxu1 %v2527_v40 }
 0x514   : > { %3088 = vmatprep.subr.mxu1 %v3220_v7 }
 0x515   : > { %3089 = vmatpush3.msra.mxu1 %v2526_v37 }
 0x516   : > { %3090 = vmatprep.subr.mxu1 %v3220_v7 }
 0x517   : > { %3091 = vmatpush3.msra.mxu1 %v2525_v41 }
 0x5af   : > { %v2168_v52 = vpop.f32.mrf.mxu0 }
 0x5b0   : > { %v2391_v58 = vsel %vm437_vm0, %v2168_v52, 0.0 }
 0x5b1   : > { %v3033_v53 = vpop.f32.mrf.mxu0 }
 0x5b3   : > { %v2241_v54 = vpop.f32.mrf.mxu1 }
 0x5b4   : > { %v2392_v56 = vsel %vm437_vm0, %v2241_v54, 0.0 }
 0x5b5   : > { %v3038_v55 = vpop.f32.mrf.mxu1  ;;  %v2393_v59 = vadd.f32 %v2392_v56, %v2391_v58 }
 0x5b7   : > { %v2387_v57 = vpop.f32.mrf.mxu1 }
 0x5b8   : > { %v2396_v2 = vsel %vm437_vm0, %v2387_v57, 0.0 }
 0x5b9   : > { %v2314_v60 = vpop.f32.mrf.mxu0  ;;  %v3048_v61 = vpop.f32.mrf.mxu1 }
 0x5ba   : > { %v2394_v62 = vsel %vm437_vm0, %v2314_v60, 0.0 }
 0x5bb   : > { %v2395_v63 = vadd.f32 %v2394_v62, %v2393_v59  ;;  %v3043_v1 = vpop.f32.mrf.mxu0 }
 0x5bd   : > { %v2397_v4 = vadd.f32 %v2396_v2, %v2395_v63 }
 0x5bf   : > { %v2405_v5 = vadd.f32 %v2741_v3, %v2397_v4 }
 0x5c1   : > { %v3728_v6 = vadd.f32 %v2405_v5, %v3346_v0  ;;  %v2438_v0 = vld [vmem:[%s3870_s9 + $0x10] sm:$0xff] }
 0x5c2   : > { %3052 = vmatpush3.msra.mxu0 %v2438_v0 }
 0x5c3   : > { %v2407_v8 = vsel %vm437_vm0, %v3728_v6, 0.0  ;;  %3053 = vmatprep.subr.mxu0 %v3220_v7 }
 0x5c4   : > { %2408 = vadd.xlane.f32.xlu0 %v2407_v8  ;;  %3054 = vmatpush3.msra.mxu0 %v2437_v15 }
 0x5c5   : > { %3055 = vmatprep.subr.mxu0 %v3220_v7  ;;  %v2746_v7 = vld [vmem:[%s3873_s12] ss:$0 sm:$0xff] }
 0x5c6   : > { %3056 = vmatpush3.msra.mxu0 %v2436_v16 }
 0x64d   : > { %v2409_v9 = vpop.xlane.xlu0 %2408 }
 0x64e   : > { %v2410_v10 = vmul.f32 0.03125, %v2409_v9 }
 0x650   : > { %v2411_v11 = vsub.f32 %v3728_v6, %v2410_v10 }
 0x652   : > { %v2412_v12 = vmul.f32 %v2411_v11, %v2411_v11 }
 0x654   : > { %v2413_v13 = vsel %vm437_vm0, %v2412_v12, 0.0 }
 0x655   : > { %2414 = vadd.xlane.f32.xlu1 %v2413_v13 }
 0x6de   : > { %v2415_v21 = vpop.xlane.xlu1 %2414 }
 0x6df   : > { %v2416_v22 = vmul.f32 0.03125, %v2415_v21 }
 0x6e1   : > { %v2417_v23 = vadd.f32 1e-05, %v2416_v22 }
 0x6e3   : > { %3154 = vrsqrt.f32 %v2417_v23 }
 0x6f0   : > { %v3155_v24 = vpop.eup %3154 }
 0x6f1   : > { %v2419_v26 = vmul.f32 %v3155_v24, %v2411_v11 }
 0x6f3   : > { %v2427_v28 = vmul.f32 %v2742_v25, %v2419_v26 }
 0x6f5   : > { %v2435_v29 = vadd.f32 %v2743_v27, %v2427_v28 }
 0x6f7   : > { %3058 = vmatmul.mubr.msk.f32.vlgmr.msra.gmra.mxu0 %vm437_vm0, %v2435_v29 }
 0x7b7   : > { %v2516_v43 = vpop.f32.mrf.mxu0 }
 0x7b8   : > { %v2517_v44 = vadd.f32 %v2744_v42, %v2516_v43 }
 0x7b9   : > { %v3059_v45 = vpop.f32.mrf.mxu0 }
 0x7ba   : > { %v2521_v46 = vmul.f32 0.70710677, %v2517_v44  ;;  %v2520_v48 = vmul.f32 0.5, %v2517_v44 }
 0x7bc   : > { %3156 = verf.f32 %v2521_v46 }
 0x7c9   : > { %v3157_v47 = vpop.eup %3156 }
 0x7ca   : > { %v2523_v49 = vadd.f32 1.0, %v3157_v47 }
 0x7cc   : > { %v2524_v50 = vmul.f32 %v2523_v49, %v2520_v48 }
 0x7ce   : > { %3093 = vmatmul.mubr.f32.vlgmr.msra.gmra.mxu1 %v2524_v50 }
 0x88e   : > { %v2614_v51 = vpop.f32.mrf.mxu1 }
 0x88f   : > { %v2615_v52 = vadd.f32 %v2746_v7, %v2614_v51 }
 0x890   : > { %v3094_v53 = vpop.f32.mrf.mxu1 }
 0x891   : > { %v2618_v54 = vadd.f32 %v2615_v52, %v3728_v6 }
 0x893   : > { %2619 = vst.msk [vmem:[%s431_s15] sm:$0xff] %vm437_vm0, %v2618_v54 }
 0x894   : > { %3171 = shalt.err (!%p3168_p3)
}
 0x895   : > { %s3172_s0 = scalar_lea.hbm %s2632_s1, 128  ;;  %s3176_s30 = scalar_lea.hbm %s3874_s13, 256 }
 0x896   : > { %p3173_p4 = scmp.ne.s32.totalorder %s2632_s1, %s3172_s0  ;;  %p3177_p9 = scmp.lt.s32.totalorder %s2632_s1, %s3874_s13 }
 0x897   : > { %p3178_p10 = scmp.lt.s32.totalorder %s3176_s30, %s3172_s0 }
 0x898   : > { %p3174_p7 = pnand %p3173_p4, %p3331_p5 }
 0x899   : > { %p3179_p11 = por %p3178_p10, %p3177_p9 }
 0x89a   : > { %p3175_p8 = pneg %p3174_p7 }
 0x89c   : > { %p3180_p12 = pnand %p3179_p11, %p3175_p8 }
 0x89e   : > { %3183 = shalt.err (!%p3180_p12)
}
 0x89f   : > { %3095 = dma.vmem_to_hbm [thread:$0]  (%p3331_p5), %s2635_s16, 128, %s2632_s1, %s2621_s2  }
 0x8a0 PF: > { %p3101_p13 = scmp.ge.s32.totalorder %s3218_s28, 2  ;;  %s2646_s3 = sand.u32 1, %s3206_s25  }
 0x8a1   : > { %s2647_s29 = scalar_lea.sflag [#allocation3], %s2646_s3 }
 0x8a2   : > { %p3098_p0 = pnand %p3101_p13, %p3335_p6 }
 0x8a4   : > { %p3099_p1 = pneg %p3098_p0 }
 0x8a6   : > { %3201 = dma.done.wait (%p3099_p1), %s2647_s29, 128  }
 0x8a7   : > { %3203 = vsyncadd (%p3099_p1), %s2647_s29, 4294967168  ;;  %p23_p2 = scmp.ge.s32.totalorder %s3318_s14, 4   ;;  %s3885_s25 = smov %s3210_s26 }
 0x8a8   : > { %s3886_s26 = smov %s3214_s27  ;;  %s3887_s27 = smov %s3329_s17 }
 0x8a9   : > { %s3888_s28 = smov %s3318_s14  ;;  %25 = sbr.rel (!%p23_p2) target bundleno = 8 (0x8), region = 107 }
 0x8ae   :  { %2652 = vsyncpa [#allocation3], 1 }
 0x8af   :  { %2654 = vsyncpa [#allocation3 + $0x1], 1 }

</bundles_post_ra>
